<compile_context>
chip_gen: v7x
topology: tpu7x:2x2x1
jax: 0.10.0
libtpu: 0.0.40
codegen_flags: <defaults>
</compile_context>

<pallas_src>
import functools

import jax
import jax.numpy as jnp
from jax import lax
from jax.experimental import pallas as pl
from jax.experimental.pallas import tpu as pltpu


# --------------------------------------------------------------------------- #
# Kernel
# --------------------------------------------------------------------------- #
def _depth_to_space_kernel(x_ref, o_ref, *, bs, W, wbs):
    # x_ref: (bs*bs, TC*H, W)   x_ref[b1*bs + b2, c*H + h, w]
    # o_ref: (TC*H, bs*wbs)     o_ref[c*H + h, b1*wbs + w*bs + b2]
    out_w = bs * wbs

    # Column-scatter one-hots built in-kernel (no HBM input):
    #   cm[w, b1*wbs + w*bs + b2] = 1
    lane = lax.broadcasted_iota(jnp.int32, (W, out_w), 1)
    wrow = lax.broadcasted_iota(jnp.int32, (W, out_w), 0)

    if x_ref.dtype == jnp.float32:
        # Exact-by-construction f32 path: split into 3 bf16 chunks whose sum
        # reconstructs the f32 value (<= 1 ulp), permute each chunk on the
        # native bf16 MXU with f32 accumulation, and sum in f32.
        def lhs_terms(v):
            terms, r = [], v
            for _ in range(3):
                c = r.astype(jnp.bfloat16)
                terms.append(c)
                r = r - c.astype(jnp.float32)
            return terms
    else:  # bfloat16: single dot, bit-exact (bf16 one-hot, f32 accumulate).
        def lhs_terms(v):
            return [v]

    acc = None
    for b1 in range(bs):
        for b2 in range(bs):
            cm = jnp.where(lane == wrow * bs + (b1 * wbs + b2),
                           1.0, 0.0).astype(jnp.bfloat16)
            for term in lhs_terms(x_ref[b1 * bs + b2]):
                d = jnp.dot(term, cm, preferred_element_type=jnp.float32)
                acc = d if acc is None else acc + d

    # Single lane-dense store covering the full output block width.
    o_ref[...] = acc.astype(o_ref.dtype)


# --------------------------------------------------------------------------- #
# Tiling / VMEM planning
# --------------------------------------------------------------------------- #
def _per_tc_vmem_bytes(bs, H, W, itemsize):
    """Simultaneously-live VMEM bytes per unit of the channel block TC:
       2x double-buffered input block, 2x double-buffered output block,
       f32 accumulator + one in-flight f32 MXU result."""
    return bs * bs * H * W * (4 * itemsize + 8)


def _vmem_plan():
    """Generation-aware VMEM sizing: (physical, compiler limit, tile budget)."""
    phys = 64 * 1024 * 1024            # conservative default (v7x per-TC VMEM)
    try:
        phys = int(pltpu.get_tpu_info().vmem_capacity_bytes)
    except Exception:                   # not on TPU / API unavailable
        pass
    # Ask the compiler for ~3/4 of physical, capped at 96 MiB:
    #   v5e/v6e (128 MiB) -> 96 MiB;  v7x (64 MiB) -> 48 MiB.
    limit = max(32 * 1024 * 1024, min(phys * 3 // 4, 96 * 1024 * 1024))
    # What the tile-size search may spend (headroom for Mosaic scratch,
    # semaphores, the small in-kernel one-hots and pipelining slack).
    budget = (limit * 2) // 3
    return phys, limit, budget


def _pick_channels_per_step(Cp, H, N, per_tc_bytes, budget_bytes):
    """Largest legal channel block TC (divisor of Cp) fitting the VMEM budget,
    while keeping >= 2 grid steps when the batch axis cannot provide them."""
    divisors = [d for d in range(1, Cp + 1) if Cp % d == 0]
    # (8,128) rule: second-to-last block dim (TC*H) must be 8-aligned or full.
    legal = [d for d in divisors if d == Cp or (d * H) % 8 == 0]
    fitting = [d for d in legal if d * per_tc_bytes <= budget_bytes]
    if fitting:
        if N < 2:   # v7x has 2 TensorCores: keep >= 2 parallel grid steps.
            split = [d for d in fitting if Cp // d >= 2]
            if split:
                return max(split)
        return max(fitting)
    # Nothing fits: smallest legal tile (compiler limit is raised to cover it).
    # TODO(synk): add an H-split grid axis for shapes where even this overflows.
    return min(legal)


# --------------------------------------------------------------------------- #
# Wrapper
# --------------------------------------------------------------------------- #
def depth_to_space(x, block_size):
    bs = int(block_size)
    N, C, H, W = x.shape
    if C % (bs * bs):
        raise ValueError("C must be divisible by block_size**2")
    if bs == 1:
        return x
    if x.dtype not in (jnp.dtype(jnp.float32), jnp.dtype(jnp.bfloat16)):
        # TODO(synk): exact non-MXU scatter path for integer / f16 / fp8 dtypes.
        raise NotImplementedError("depth_to_space supports float32/bfloat16 only")

    Cp = C // (bs * bs)
    wbs = W * bs
    itemsize = jnp.dtype(x.dtype).itemsize

    phys, vmem_limit, vmem_budget = _vmem_plan()
    per_tc = _per_tc_vmem_bytes(bs, H, W, itemsize)
    tc = _pick_channels_per_step(Cp, H, N, per_tc, vmem_budget)
    # Guard the fallback path: ensure the requested limit covers the chosen
    # block (never exceeding physical VMEM).
    vmem_limit = min(phys, max(vmem_limit, tc * per_tc + (2 << 20)))

    # Metadata-only input view:
    #   x4[n, b1*bs + b2, c*H + h, w] == x[n, (b1*bs + b2)*Cp + c, h, w]
    x4 = x.reshape(N, bs * bs, Cp * H, W)

    kernel = functools.partial(_depth_to_space_kernel, bs=bs, W=W, wbs=wbs)

    out3 = pl.pallas_call(
        kernel,
        out_shape=jax.ShapeDtypeStruct((N, Cp * H, bs * wbs), x.dtype),
        grid_spec=pltpu.PrefetchScalarGridSpec(
            num_scalar_prefetch=0,
            grid=(N, Cp // tc),
            in_specs=[
                pl.BlockSpec((None, bs * bs, tc * H, W),
                             lambda n, c: (n, 0, c, 0)),
            ],
            out_specs=pl.BlockSpec((None, tc * H, bs * wbs),
                                   lambda n, c: (n, c, 0)),
        ),
        compiler_params=pltpu.CompilerParams(
            dimension_semantics=("parallel", "parallel"),
            vmem_limit_bytes=int(vmem_limit)),
    )(x4)

    # out3[n, c*H + h, b1*wbs + w*bs + b2] == out[n, c, h*bs + b1, w*bs + b2]:
    # collapsing adjacent dims is a free (metadata-only) reshape.
    return out3.reshape(N, Cp, H * bs, W * bs)


def _reference_depth_to_space(x, bs):
    # Pure-jnp replica of the PyTorch forward, for verification.
    N, C, H, W = x.shape
    y = x.reshape(N, bs, bs, C // bs ** 2, H, W)
    y = jnp.transpose(y, (0, 3, 4, 1, 5, 2))
    return y.reshape(N, C // bs ** 2, H * bs, W * bs)


if __name__ == "__main__":
    key = jax.random.PRNGKey(0)
    N, C, H, W = 2, 8, 16, 16
    bs = 2

    # float32 path (bf16-chunked exact permutation; <= 1 ulp).
    x = jax.random.normal(key, (N, C, H, W), dtype=jnp.float32)
    out = jax.block_until_ready(depth_to_space(x, bs))
    ref = _reference_depth_to_space(x, bs)
    assert out.shape == (N, C // bs ** 2, H * bs, W * bs)
    assert out.dtype == x.dtype
    assert jnp.allclose(out, ref), "Pallas DepthToSpace mismatch vs reference (f32)"

    # native bfloat16 path: permutation must be bit-exact.
    xb = x.astype(jnp.bfloat16)
    outb = jax.block_until_ready(depth_to_space(xb, bs))
    refb = _reference_depth_to_space(xb, bs)
    assert outb.dtype == jnp.bfloat16
    assert jnp.array_equal(outb, refb), "Pallas DepthToSpace mismatch vs reference (bf16)"

    print("KERNEL_OK")
</pallas_src>

<mosaic_0001>
module attributes {stable_mosaic.version = 11 : i64} {
  func.func @_depth_to_space_kernel(%arg0: i32, %arg1: i32, %arg2: memref<1x4x32x16xf32, #tpu.memory_space<vmem>>, %arg3: memref<1x32x64xf32, #tpu.memory_space<vmem>>) attributes {dimension_semantics = [#tpu.dimension_semantics<parallel>, #tpu.dimension_semantics<parallel>], iteration_bounds = array<i64: 2, 1>, scalar_prefetch = 0 : i64, scratch_operands = 0 : i64, tpu.core_type = #tpu.core_type<tc>, window_params = [{transform_indices = @transform_0, window_bounds = array<i64: 1, 4, 32, 16>}, {transform_indices = @transform_1, window_bounds = array<i64: 1, 32, 64>}]} {
    %0 = tpu.iota {dimensions = array<i32: 1>} : vector<16x64xi32>
    %1 = tpu.iota {dimensions = array<i32: 0>} : vector<16x64xi32>
    %c2_i32 = arith.constant 2 : i32
    %2 = vector.broadcast %c2_i32 : i32 to vector<16x64xi32>
    %3 = arith.muli %1, %2 : vector<16x64xi32>
    %c0_i32 = arith.constant 0 : i32
    %4 = vector.broadcast %c0_i32 : i32 to vector<16x64xi32>
    %5 = arith.addi %3, %4 : vector<16x64xi32>
    %6 = arith.cmpi eq, %0, %5 : vector<16x64xi32>
    %cst = arith.constant 1.000000e+00 : f32
    %cst_0 = arith.constant 0.000000e+00 : f32
    %7 = vector.broadcast %cst : f32 to vector<16x64xf32>
    %8 = vector.broadcast %cst_0 : f32 to vector<16x64xf32>
    %9 = arith.select %6, %7, %8 : vector<16x64xi1>, vector<16x64xf32>
    %10 = arith.truncf %9 : vector<16x64xf32> to vector<16x64xbf16>
    %c0 = arith.constant 0 : index
    %c0_1 = arith.constant 0 : index
    %c0_2 = arith.constant 0 : index
    %c0_3 = arith.constant 0 : index
    %11 = vector.load %arg2[%c0, %c0_1, %c0_2, %c0_3] : memref<1x4x32x16xf32, #tpu.memory_space<vmem>>, vector<1x1x32x16xf32>
    %12 = vector.shape_cast %11 : vector<1x1x32x16xf32> to vector<32x16xf32>
    %13 = arith.truncf %12 : vector<32x16xf32> to vector<32x16xbf16>
    %14 = arith.extf %13 : vector<32x16xbf16> to vector<32x16xf32>
    %15 = arith.subf %12, %14 : vector<32x16xf32>
    %16 = arith.truncf %15 : vector<32x16xf32> to vector<32x16xbf16>
    %17 = arith.extf %16 : vector<32x16xbf16> to vector<32x16xf32>
    %18 = arith.subf %15, %17 : vector<32x16xf32>
    %19 = arith.truncf %18 : vector<32x16xf32> to vector<32x16xbf16>
    %cst_4 = arith.constant dense<0.000000e+00> : vector<32x64xf32>
    %20 = tpu.matmul %13, %10, %cst_4 {dimension_numbers = #tpu.dot_dimension_numbers<[1], [0], [0], [1], [0, 0, 1, 1], [], []>} : vector<32x16xbf16>, vector<16x64xbf16>, vector<32x64xf32> -> vector<32x64xf32>
    %cst_5 = arith.constant dense<0.000000e+00> : vector<32x64xf32>
    %21 = tpu.matmul %16, %10, %cst_5 {dimension_numbers = #tpu.dot_dimension_numbers<[1], [0], [0], [1], [0, 0, 1, 1], [], []>} : vector<32x16xbf16>, vector<16x64xbf16>, vector<32x64xf32> -> vector<32x64xf32>
    %22 = arith.addf %20, %21 : vector<32x64xf32>
    %cst_6 = arith.constant dense<0.000000e+00> : vector<32x64xf32>
    %23 = tpu.matmul %19, %10, %cst_6 {dimension_numbers = #tpu.dot_dimension_numbers<[1], [0], [0], [1], [0, 0, 1, 1], [], []>} : vector<32x16xbf16>, vector<16x64xbf16>, vector<32x64xf32> -> vector<32x64xf32>
    %24 = arith.addf %22, %23 : vector<32x64xf32>
    %c2_i32_7 = arith.constant 2 : i32
    %25 = vector.broadcast %c2_i32_7 : i32 to vector<16x64xi32>
    %26 = arith.muli %1, %25 : vector<16x64xi32>
    %c1_i32 = arith.constant 1 : i32
    %27 = vector.broadcast %c1_i32 : i32 to vector<16x64xi32>
    %28 = arith.addi %26, %27 : vector<16x64xi32>
    %29 = arith.cmpi eq, %0, %28 : vector<16x64xi32>
    %cst_8 = arith.constant 1.000000e+00 : f32
    %cst_9 = arith.constant 0.000000e+00 : f32
    %30 = vector.broadcast %cst_8 : f32 to vector<16x64xf32>
    %31 = vector.broadcast %cst_9 : f32 to vector<16x64xf32>
    %32 = arith.select %29, %30, %31 : vector<16x64xi1>, vector<16x64xf32>
    %33 = arith.truncf %32 : vector<16x64xf32> to vector<16x64xbf16>
    %c0_10 = arith.constant 0 : index
    %c1 = arith.constant 1 : index
    %c0_11 = arith.constant 0 : index
    %c0_12 = arith.constant 0 : index
    %34 = vector.load %arg2[%c0_10, %c1, %c0_11, %c0_12] : memref<1x4x32x16xf32, #tpu.memory_space<vmem>>, vector<1x1x32x16xf32>
    %35 = vector.shape_cast %34 : vector<1x1x32x16xf32> to vector<32x16xf32>
    %36 = arith.truncf %35 : vector<32x16xf32> to vector<32x16xbf16>
    %37 = arith.extf %36 : vector<32x16xbf16> to vector<32x16xf32>
    %38 = arith.subf %35, %37 : vector<32x16xf32>
    %39 = arith.truncf %38 : vector<32x16xf32> to vector<32x16xbf16>
    %40 = arith.extf %39 : vector<32x16xbf16> to vector<32x16xf32>
    %41 = arith.subf %38, %40 : vector<32x16xf32>
    %42 = arith.truncf %41 : vector<32x16xf32> to vector<32x16xbf16>
    %cst_13 = arith.constant dense<0.000000e+00> : vector<32x64xf32>
    %43 = tpu.matmul %36, %33, %cst_13 {dimension_numbers = #tpu.dot_dimension_numbers<[1], [0], [0], [1], [0, 0, 1, 1], [], []>} : vector<32x16xbf16>, vector<16x64xbf16>, vector<32x64xf32> -> vector<32x64xf32>
    %44 = arith.addf %24, %43 : vector<32x64xf32>
    %cst_14 = arith.constant dense<0.000000e+00> : vector<32x64xf32>
    %45 = tpu.matmul %39, %33, %cst_14 {dimension_numbers = #tpu.dot_dimension_numbers<[1], [0], [0], [1], [0, 0, 1, 1], [], []>} : vector<32x16xbf16>, vector<16x64xbf16>, vector<32x64xf32> -> vector<32x64xf32>
    %46 = arith.addf %44, %45 : vector<32x64xf32>
    %cst_15 = arith.constant dense<0.000000e+00> : vector<32x64xf32>
    %47 = tpu.matmul %42, %33, %cst_15 {dimension_numbers = #tpu.dot_dimension_numbers<[1], [0], [0], [1], [0, 0, 1, 1], [], []>} : vector<32x16xbf16>, vector<16x64xbf16>, vector<32x64xf32> -> vector<32x64xf32>
    %48 = arith.addf %46, %47 : vector<32x64xf32>
    %c2_i32_16 = arith.constant 2 : i32
    %49 = vector.broadcast %c2_i32_16 : i32 to vector<16x64xi32>
    %50 = arith.muli %1, %49 : vector<16x64xi32>
    %c32_i32 = arith.constant 32 : i32
    %51 = vector.broadcast %c32_i32 : i32 to vector<16x64xi32>
    %52 = arith.addi %50, %51 : vector<16x64xi32>
    %53 = arith.cmpi eq, %0, %52 : vector<16x64xi32>
    %cst_17 = arith.constant 1.000000e+00 : f32
    %cst_18 = arith.constant 0.000000e+00 : f32
    %54 = vector.broadcast %cst_17 : f32 to vector<16x64xf32>
    %55 = vector.broadcast %cst_18 : f32 to vector<16x64xf32>
    %56 = arith.select %53, %54, %55 : vector<16x64xi1>, vector<16x64xf32>
    %57 = arith.truncf %56 : vector<16x64xf32> to vector<16x64xbf16>
    %c0_19 = arith.constant 0 : index
    %c2 = arith.constant 2 : index
    %c0_20 = arith.constant 0 : index
    %c0_21 = arith.constant 0 : index
    %58 = vector.load %arg2[%c0_19, %c2, %c0_20, %c0_21] : memref<1x4x32x16xf32, #tpu.memory_space<vmem>>, vector<1x1x32x16xf32>
    %59 = vector.shape_cast %58 : vector<1x1x32x16xf32> to vector<32x16xf32>
    %60 = arith.truncf %59 : vector<32x16xf32> to vector<32x16xbf16>
    %61 = arith.extf %60 : vector<32x16xbf16> to vector<32x16xf32>
    %62 = arith.subf %59, %61 : vector<32x16xf32>
    %63 = arith.truncf %62 : vector<32x16xf32> to vector<32x16xbf16>
    %64 = arith.extf %63 : vector<32x16xbf16> to vector<32x16xf32>
    %65 = arith.subf %62, %64 : vector<32x16xf32>
    %66 = arith.truncf %65 : vector<32x16xf32> to vector<32x16xbf16>
    %cst_22 = arith.constant dense<0.000000e+00> : vector<32x64xf32>
    %67 = tpu.matmul %60, %57, %cst_22 {dimension_numbers = #tpu.dot_dimension_numbers<[1], [0], [0], [1], [0, 0, 1, 1], [], []>} : vector<32x16xbf16>, vector<16x64xbf16>, vector<32x64xf32> -> vector<32x64xf32>
    %68 = arith.addf %48, %67 : vector<32x64xf32>
    %cst_23 = arith.constant dense<0.000000e+00> : vector<32x64xf32>
    %69 = tpu.matmul %63, %57, %cst_23 {dimension_numbers = #tpu.dot_dimension_numbers<[1], [0], [0], [1], [0, 0, 1, 1], [], []>} : vector<32x16xbf16>, vector<16x64xbf16>, vector<32x64xf32> -> vector<32x64xf32>
    %70 = arith.addf %68, %69 : vector<32x64xf32>
    %cst_24 = arith.constant dense<0.000000e+00> : vector<32x64xf32>
    %71 = tpu.matmul %66, %57, %cst_24 {dimension_numbers = #tpu.dot_dimension_numbers<[1], [0], [0], [1], [0, 0, 1, 1], [], []>} : vector<32x16xbf16>, vector<16x64xbf16>, vector<32x64xf32> -> vector<32x64xf32>
    %72 = arith.addf %70, %71 : vector<32x64xf32>
    %c2_i32_25 = arith.constant 2 : i32
    %73 = vector.broadcast %c2_i32_25 : i32 to vector<16x64xi32>
    %74 = arith.muli %1, %73 : vector<16x64xi32>
    %c33_i32 = arith.constant 33 : i32
    %75 = vector.broadcast %c33_i32 : i32 to vector<16x64xi32>
    %76 = arith.addi %74, %75 : vector<16x64xi32>
    %77 = arith.cmpi eq, %0, %76 : vector<16x64xi32>
    %cst_26 = arith.constant 1.000000e+00 : f32
    %cst_27 = arith.constant 0.000000e+00 : f32
    %78 = vector.broadcast %cst_26 : f32 to vector<16x64xf32>
    %79 = vector.broadcast %cst_27 : f32 to vector<16x64xf32>
    %80 = arith.select %77, %78, %79 : vector<16x64xi1>, vector<16x64xf32>
    %81 = arith.truncf %80 : vector<16x64xf32> to vector<16x64xbf16>
    %c0_28 = arith.constant 0 : index
    %c3 = arith.constant 3 : index
    %c0_29 = arith.constant 0 : index
    %c0_30 = arith.constant 0 : index
    %82 = vector.load %arg2[%c0_28, %c3, %c0_29, %c0_30] : memref<1x4x32x16xf32, #tpu.memory_space<vmem>>, vector<1x1x32x16xf32>
    %83 = vector.shape_cast %82 : vector<1x1x32x16xf32> to vector<32x16xf32>
    %84 = arith.truncf %83 : vector<32x16xf32> to vector<32x16xbf16>
    %85 = arith.extf %84 : vector<32x16xbf16> to vector<32x16xf32>
    %86 = arith.subf %83, %85 : vector<32x16xf32>
    %87 = arith.truncf %86 : vector<32x16xf32> to vector<32x16xbf16>
    %88 = arith.extf %87 : vector<32x16xbf16> to vector<32x16xf32>
    %89 = arith.subf %86, %88 : vector<32x16xf32>
    %90 = arith.truncf %89 : vector<32x16xf32> to vector<32x16xbf16>
    %cst_31 = arith.constant dense<0.000000e+00> : vector<32x64xf32>
    %91 = tpu.matmul %84, %81, %cst_31 {dimension_numbers = #tpu.dot_dimension_numbers<[1], [0], [0], [1], [0, 0, 1, 1], [], []>} : vector<32x16xbf16>, vector<16x64xbf16>, vector<32x64xf32> -> vector<32x64xf32>
    %92 = arith.addf %72, %91 : vector<32x64xf32>
    %cst_32 = arith.constant dense<0.000000e+00> : vector<32x64xf32>
    %93 = tpu.matmul %87, %81, %cst_32 {dimension_numbers = #tpu.dot_dimension_numbers<[1], [0], [0], [1], [0, 0, 1, 1], [], []>} : vector<32x16xbf16>, vector<16x64xbf16>, vector<32x64xf32> -> vector<32x64xf32>
    %94 = arith.addf %92, %93 : vector<32x64xf32>
    %cst_33 = arith.constant dense<0.000000e+00> : vector<32x64xf32>
    %95 = tpu.matmul %90, %81, %cst_33 {dimension_numbers = #tpu.dot_dimension_numbers<[1], [0], [0], [1], [0, 0, 1, 1], [], []>} : vector<32x16xbf16>, vector<16x64xbf16>, vector<32x64xf32> -> vector<32x64xf32>
    %96 = arith.addf %94, %95 : vector<32x64xf32>
    %c0_34 = arith.constant 0 : index
    %c0_35 = arith.constant 0 : index
    %c0_36 = arith.constant 0 : index
    %97 = vector.load %arg3[%c0_34, %c0_35, %c0_36] : memref<1x32x64xf32, #tpu.memory_space<vmem>>, vector<1x32x64xf32>
    %98 = vector.shape_cast %97 : vector<1x32x64xf32> to vector<32x64xf32>
    %99 = vector.shape_cast %96 : vector<32x64xf32> to vector<1x32x64xf32>
    tpu.vector_store %arg3[%c0_34, %c0_35, %c0_36], %99 {strides = array<i32>} : memref<1x32x64xf32, #tpu.memory_space<vmem>>, vector<1x32x64xf32>,
    return
  }
  func.func @transform_0(%arg0: i32, %arg1: i32) -> (i32, i32, i32, i32) {
    %c0_i32 = arith.constant 0 : i32
    %c0_i32_0 = arith.constant 0 : i32
    %c0_i32_1 = arith.constant 0 : i32
    return %arg0, %c0_i32, %arg1, %c0_i32_0 : i32, i32, i32, i32
  }
  func.func @transform_1(%arg0: i32, %arg1: i32) -> (i32, i32, i32) {
    %c0_i32 = arith.constant 0 : i32
    %c0_i32_0 = arith.constant 0 : i32
    return %arg0, %arg1, %c0_i32 : i32, i32, i32
  }
}

</mosaic_0001>

<bundles_post_ra>
// kernel: tpu_custom_call.1
= control target key start
LH: loop header
LB: loop body
LE: loop exit
PB: predicated region body
PF: predicated region fallthrough
CT: control target
= control target key end

     0   :  { %6 = vsyncpa [#allocation3], 0  ;;  %s1743_s0 = inlined_call_operand.vmem [shape: f32[2,4,32,16], index: 0, kind: input, shape index: {}]   ;;  %s1744_s1 = inlined_call_operand.hbm [shape: f32[2,32,64], index: 1, kind: output, shape index: {}]  }
   0x1   :  { %8 = vsyncpa [#allocation3 + $0x1], 0  ;;  %s1467_s6 = smov 0   ;;  %s1469_s7 = smov 0  }
   0x2   :  { %s1471_s8 = smov 0   ;;  %s1473_s9 = smov 0  }
   0x3   :  { %s1475_s10 = smov 0   ;;  %s1477_s11 = smov 0  }
   0x4 LB: > { %s1088_s12 = sadd.s32 4294967295, %s1451_s11   ;;  %s1089_s13 = sadd.s32 4294967294, %s1451_s11   ;;  %s1451_s11 = sphi %s1477_s11, %s14_s11   ;;  %s1447_s10 = sphi %s1475_s10, %s1759_s10   ;;  %s1443_s9 = sphi %s1473_s9, %s1758_s9   ;;  %s1439_s8 = sphi %s1471_s8, %s1757_s8   ;;  %s1435_s7 = sphi %s1469_s7, %s1756_s7   ;;  %s1431_s6 = sphi %s1467_s6, %s1755_s6  }
   0x5   : > { %s26_s14 = sadd.s32 1, %s1447_s10  ;;  %s63_s15 = sadd.s32 1, %s1439_s8 }
   0x6   : > { %p28_p0 = scmp.ge.s32.totalorder %s26_s14, 2  ;;  %p73_p1 = scmp.ne.s32.totalorder %s1439_s8, %s1435_s7 }
   0x7   : > { %p74_p2 = scmp.eq.s32.totalorder %s1088_s12, 1  ;;  %p79_p3 = scmp.ne.s32.totalorder %s1435_s7, %s1431_s6 }
   0x8   : > { %s1761_s14 = smov (%p28_p0, %s26_s14), 0  ;;  %p80_p5 = scmp.eq.s32.totalorder %s1089_s13, 1 }
   0x9   : > { %p1507_p4 = por %p74_p2, %p73_p1  ;;  %s58_s17 = ssub.s32 %s1447_s10, %s1761_s14 }
   0xa   : > { %p1092_p6 = scmp.ge.s32.totalorder %s1451_s11, 1  ;;  %p61_p7 = scmp.eq.s32.totalorder %s58_s17, 0 }
   0xb   : > { %p1514_p8 = por %p80_p5, %p79_p3  ;;  %p111_p9 = scmp.lt.s32.totalorder %s1451_s11, 3 }
   0xc   : > { %s1520_s19 = scalar_select %p61_p7, %s1439_s8, %s63_s15  }
   0xd   : > { %p112_p10 = pnand %p1092_p6, %p111_p9 }
   0xe   : > { %v147_v0 = vlaneseq (!%p112_p10)  ;;  %p136_p11 = scmp.lt.s32.totalorder (!%p112_p10), %s1443_s9, 1  ;;  %vm185_vm1 = vcmask (!%p112_p10), 130048   ;;  %v1453_v22 = vmov (!%p112_p10), 1.0|1.0   ;;  %s132_s25 = sand.u32 (!%p112_p10), 1, %s1435_s7   ;;  %vm988_vm13 = vcmask (!%p112_p10), 523264  }
   0xf   : > { %115 = sbr.rel (%p112_p10) target bundleno = 328 (0x148), region = 24  ;;  %s1093_s26 = sshll.u32 (!%p112_p10), %s132_s25, 5 }
  0x10   : > { %v1523_v1 = vand.u32 (!%p112_p10), 127, %v147_v0  ;;  %v150_v2 = vshrl.u32 (!%p112_p10), %v147_v0, 7  ;;  %s134_s27 = scalar_lea.vmem (!%p112_p10), [#allocation2], %s1093_s26  ;;  %s1162_s29 = sshll.u32 (!%p112_p10), %s1443_s9, 9 }
  0x11   : > { %s1009_s28 = sshll.u32 (!%p112_p10), %s134_s27, 4  ;;  %s1692_s3 = scalar_lea.hbm (!%p112_p10), %s1744_s1, %s1162_s29  ;;  %s1687_s28 = int_to_ptr.vmem [resolvable:$true] %s1009_s28 }
  0x12   : > { %v151_v3 = vadd.s32 (!%p112_p10), 8, %v150_v2  ;;  %v1526_v4 = vmul.u32 (!%p112_p10), 2, %v150_v2  ;;  %s1697_s4 = scalar_lea.sflag (!%p112_p10), [#allocation3], %s132_s25  ;;  %s1373_s5 = scalar_lea.vmem (!%p112_p10), %s1687_s28, 512 }
  0x13   : > { %p1374_p12 = scmp.ne.s32.totalorder (!%p112_p10), %s1687_s28, %s1373_s5 }
  0x14   : > { %v1533_v5 = vmul.u32 (!%p112_p10), 2, %v151_v3  ;;  %vm154_vm0 = vcmp.eq.s32.totalorder (!%p112_p10), %v1523_v1, %v1526_v4  ;;  %v566_v6 = vadd.s32 (!%p112_p10), 32, %v1526_v4  ;;  %v355_v46 = vadd.s32 (!%p112_p10), 1, %v1526_v4 }
  0x15   : > { %v777_v50 = vadd.s32 (!%p112_p10), 33, %v1526_v4  ;;  %p1375_p13 = pnand (!%p112_p10), %p1374_p12, %p1507_p4 }
  0x16   : > { %s137_s20 = scalar_select %p136_p11, %s1443_s9, 1  ;;  %vm155_vm2 = vcmp.eq.s32.totalorder %v1523_v1, %v1533_v5  ;;  %v567_v14 = vadd.s32 32, %v1533_v5  ;;  %vm568_vm3 = vcmp.eq.s32.totalorder %v1523_v1, %v566_v6  ;;  %v356_v47 = vadd.s32 1, %v1533_v5 }
  0x17   : > { %vm1548_vm4 = vmpackc.low %vm155_vm2, %vm154_vm0  ;;  %v778_v51 = vadd.s32 33, %v1533_v5  ;;  %vm357_vm7 = vcmp.eq.s32.totalorder %v1523_v1, %v355_v46  ;;  %vm779_vm9 = vcmp.eq.s32.totalorder %v1523_v1, %v777_v50  ;;  %p1376_p0 = pneg %p1375_p13  ;;  %s1454_s9 = smov [#allocation2]  }
  0x18   : > { %s1161_s21 = sshll.u32 %s137_s20, 7  ;;  %1199 = vmatprep.subr.msk.bf16.mxu1 %vm1548_vm4, %v1453_v22  ;;  %vm569_vm5 = vcmp.eq.s32.totalorder %v1523_v1, %v567_v14  ;;  %vm358_vm8 = vcmp.eq.s32.totalorder %v1523_v1, %v356_v47  ;;  %s1377_s12 = sshll.u32 %s1454_s9, 4  ;;  %s1378_s12 = int_to_ptr.vmem [resolvable:$false] %s1377_s12 }
  0x19   : > { %s1531_s24 = scalar_lea.vmem %s1743_s0, %s1161_s21  ;;  %vm1561_vm6 = vmpackc.low %vm569_vm5, %vm568_vm3  ;;  %1200 = vmatpush3.bf16.msk.msra.mxu1 %vm1548_vm4, %v1453_v22  ;;  %vm780_vm10 = vcmp.eq.s32.totalorder %v1523_v1, %v778_v51  ;;  %s1379_s13 = scalar_lea.vmem %s1378_s12, 1024 }
  0x1a   : > { %v159_v7 = vld [vmem:[%s1531_s24] sm:$0xff]  ;;  %v160_v8 = vld [vmem:[%s1531_s24 + $0x8] sm:$0xff]  ;;  %v161_v12 = vld [vmem:[%s1531_s24 + $0x10] sm:$0xff]  ;;  %1235 = vmatprep.subr.msk.bf16.mxu0 %vm1561_vm6, %v1453_v22  ;;  %1205 = vmatprep.subr.msk.bf16.mxu1 %vm1548_vm4, %v1453_v22  ;;  %p1380_p1 = scmp.lt.s32.totalorder %s1687_s28, %s1378_s12  ;;  %p1381_p2 = scmp.lt.s32.totalorder %s1379_s13, %s1373_s5 }
  0x1b   : > { %v1124_v9 = vld [vmem:[%s1531_s24 + $0x40] sm:$0xff]  ;;  %v163_v10 = vpack.c.bf16 %v160_v8, %v159_v7  ;;  %v1125_v11 = vld [vmem:[%s1531_s24 + $0x48] sm:$0xff]  ;;  %v162_v13 = vld [vmem:[%s1531_s24 + $0x18] sm:$0xff]  ;;  %1236 = vmatpush3.bf16.msk.msra.mxu0 %vm1561_vm6, %v1453_v22 }
  0x1c   : > { %v578_v15 = vpack.c.bf16 %v1125_v11, %v1124_v9  ;;  %v1552_v19 = vpack.c.bf16 %v162_v13, %v161_v12  ;;  %v1126_v20 = vld [vmem:[%s1531_s24 + $0x50] sm:$0xff]  ;;  %v1127_v21 = vld [vmem:[%s1531_s24 + $0x58] sm:$0xff]  ;;  %1241 = vmatprep.subr.msk.bf16.mxu0 %vm1561_vm6, %v1453_v22  ;;  %vm1608_vm11 = vmpackc.low %vm358_vm8, %vm357_vm7  ;;  %p1382_p3 = por %p1381_p2, %p1380_p1 }
  0x1d   : > { %v165_v17 = vunpack.c.l.bf16 %v163_v10  ;;  %v166_v18 = vunpack.c.h.bf16 %v163_v10  ;;  %v579_v32 = vpack.c.bf16 %v1127_v21, %v1126_v20  ;;  %vm1617_vm12 = vmpackc.low %vm780_vm10, %vm779_vm9  ;;  %v1108_v3 = vld [vmem:[%s1531_s24 + $0x20] sm:$0xff]  ;;  %v1109_v4 = vld [vmem:[%s1531_s24 + $0x28] sm:$0xff] }
  0x1e   : > { %v580_v23 = vunpack.c.l.bf16 %v578_v15  ;;  %v581_v24 = vunpack.c.h.bf16 %v578_v15  ;;  %1237 = vmatprep.mubr.msk.bf16.mxu0 %vm185_vm1, %v578_v15  ;;  %v167_v28 = vunpack.c.l.bf16 %v1552_v19  ;;  %v168_v29 = vunpack.c.h.bf16 %v1552_v19  ;;  %v1140_v6 = vld [vmem:[%s1531_s24 + $0x60] sm:$0xff]  ;;  %v1142_v15 = vld [vmem:[%s1531_s24 + $0x70] sm:$0xff]  ;;  %v1143_v16 = vld [vmem:[%s1531_s24 + $0x78] sm:$0xff]  ;;  %p1383_p5 = pnand %p1382_p3, %p1376_p0 }
  0x1f   : > { %v169_v26 = vsub.f32 %v159_v7, %v165_v17  ;;  %v170_v27 = vsub.f32 %v160_v8, %v166_v18  ;;  %v582_v38 = vunpack.c.l.bf16 %v579_v32  ;;  %v583_v39 = vunpack.c.h.bf16 %v579_v32  ;;  %1238 = vmatmul.mubr.msk.bf16.vlgmr.msra.gmra.mrb[0].mxu0 %vm185_vm1, %v579_v32  ;;  %v1141_v7 = vld [vmem:[%s1531_s24 + $0x68] sm:$0xff]  ;;  %v1110_v17 = vld [vmem:[%s1531_s24 + $0x30] sm:$0xff]  ;;  %v1111_v18 = vld [vmem:[%s1531_s24 + $0x38] sm:$0xff] }
  0x20   : > { %v584_v30 = vsub.f32 %v1124_v9, %v580_v23  ;;  %v585_v31 = vsub.f32 %v1125_v11, %v581_v24  ;;  %v171_v34 = vsub.f32 %v161_v12, %v167_v28  ;;  %v172_v35 = vsub.f32 %v162_v13, %v168_v29  ;;  %1242 = vmatpush3.bf16.msk.msra.mxu0 %vm1561_vm6, %v1453_v22 }
  0x21   : > { %v173_v33 = vpack.c.bf16 %v170_v27, %v169_v26  ;;  %v586_v44 = vsub.f32 %v1126_v20, %v582_v38  ;;  %v587_v45 = vsub.f32 %v1127_v21, %v583_v39  ;;  %1247 = vmatprep.subr.msk.bf16.mxu0 %vm1561_vm6, %v1453_v22  ;;  %v367_v9 = vpack.c.bf16 %v1109_v4, %v1108_v3 }
  0x22   : > { %v174_v36 = vpack.c.bf16 %v172_v35, %v171_v34  ;;  %v588_v37 = vpack.c.bf16 %v585_v31, %v584_v30  ;;  %v790_v24 = vpack.c.bf16 %v1143_v16, %v1142_v15  ;;  %v368_v25 = vpack.c.bf16 %v1111_v18, %v1110_v17 }
  0x23   : > { %1201 = vmatprep.mubr.msk.bf16.mxu1 %vm185_vm1, %v173_v33  ;;  %v175_v40 = vunpack.c.l.bf16 %v173_v33  ;;  %v176_v41 = vunpack.c.h.bf16 %v173_v33  ;;  %v589_v54 = vpack.c.bf16 %v587_v45, %v586_v44  ;;  %v369_v11 = vunpack.c.l.bf16 %v367_v9 }
  0x24   : > { %1202 = vmatmul.mubr.msk.bf16.vlgmr.msra.gmra.mrb[0].mxu1 %vm185_vm1, %v174_v36  ;;  %1243 = vmatprep.mubr.msk.bf16.mxu0 %vm185_vm1, %v588_v37  ;;  %v590_v42 = vunpack.c.l.bf16 %v588_v37  ;;  %v591_v43 = vunpack.c.h.bf16 %v588_v37  ;;  %v177_v60 = vunpack.c.l.bf16 %v174_v36  ;;  %v178_v61 = vunpack.c.h.bf16 %v174_v36 }
  0x25   : > { %1206 = vmatpush3.bf16.msk.msra.mxu1 %vm1548_vm4, %v1453_v22  ;;  %1207 = vmatprep.mubr.msk.bf16.mxu1 %vm185_vm1, %v163_v10  ;;  %v179_v48 = vsub.f32 %v169_v26, %v175_v40  ;;  %v180_v49 = vsub.f32 %v170_v27, %v176_v41  ;;  %v592_v57 = vunpack.c.l.bf16 %v589_v54  ;;  %v593_v58 = vunpack.c.h.bf16 %v589_v54 }
  0x26   : > { %1211 = vmatprep.subr.msk.bf16.mxu1 %vm1548_vm4, %v1453_v22  ;;  %v594_v52 = vsub.f32 %v584_v30, %v590_v42  ;;  %v595_v53 = vsub.f32 %v585_v31, %v591_v43  ;;  %v181_v1 = vsub.f32 %v171_v34, %v177_v60  ;;  %v182_v2 = vsub.f32 %v172_v35, %v178_v61 }
  0x27   : > { %v183_v55 = vpack.c.bf16 %v180_v49, %v179_v48  ;;  %v596_v63 = vsub.f32 %v586_v44, %v592_v57  ;;  %v597_v0 = vsub.f32 %v587_v45, %v593_v58  ;;  %v789_v10 = vpack.c.bf16 %v1141_v7, %v1140_v6 }
  0x28   : > { %v598_v56 = vpack.c.bf16 %v595_v53, %v594_v52  ;;  %v184_v8 = vpack.c.bf16 %v182_v2, %v181_v1  ;;  %v370_v12 = vunpack.c.h.bf16 %v367_v9  ;;  %v793_v28 = vunpack.c.l.bf16 %v790_v24 }
  0x29   : > { %v599_v5 = vpack.c.bf16 %v597_v0, %v596_v63  ;;  %v791_v13 = vunpack.c.l.bf16 %v789_v10  ;;  %v792_v14 = vunpack.c.h.bf16 %v789_v10  ;;  %v794_v29 = vunpack.c.h.bf16 %v790_v24 }
  0x2a   : > { %v374_v20 = vsub.f32 %v1109_v4, %v370_v12  ;;  %v371_v30 = vunpack.c.l.bf16 %v368_v25  ;;  %v372_v31 = vunpack.c.h.bf16 %v368_v25  ;;  %v797_v36 = vsub.f32 %v1142_v15, %v793_v28 }
  0x2b   : > { %1244 = vmatmul.mubr.msk.bf16.vlgmr.msra.gmra.mrb[0].mxu0 %vm185_vm1, %v589_v54  ;;  %v795_v21 = vsub.f32 %v1140_v6, %v791_v13  ;;  %v796_v23 = vsub.f32 %v1141_v7, %v792_v14  ;;  %v798_v37 = vsub.f32 %v1143_v16, %v794_v29 }
  0x2c   : > { %1248 = vmatpush3.bf16.msk.msra.mxu0 %vm1561_vm6, %v1453_v22  ;;  %1249 = vmatprep.mubr.msk.bf16.mxu0 %vm185_vm1, %v598_v56  ;;  %v375_v38 = vsub.f32 %v1110_v17, %v371_v30  ;;  %v376_v39 = vsub.f32 %v1111_v18, %v372_v31 }
  0x2d   : > { %1253 = vmatprep.subr.msk.bf16.mxu0 %vm1617_vm12, %v1453_v22  ;;  %v799_v27 = vpack.c.bf16 %v796_v23, %v795_v21  ;;  %v800_v44 = vpack.c.bf16 %v798_v37, %v797_v36 }
  0x2e   : > { %v378_v45 = vpack.c.bf16 %v376_v39, %v375_v38 }
  0x2f   : > { %v801_v34 = vunpack.c.l.bf16 %v799_v27  ;;  %v802_v35 = vunpack.c.h.bf16 %v799_v27  ;;  %v803_v48 = vunpack.c.l.bf16 %v800_v44  ;;  %v804_v49 = vunpack.c.h.bf16 %v800_v44 }
  0x30   : > { %1208 = vmatmul.mubr.msk.bf16.vlgmr.msra.gmra.mrb[0].mxu1 %vm185_vm1, %v1552_v19  ;;  %v373_v19 = vsub.f32 %v1108_v3, %v369_v11  ;;  %v381_v50 = vunpack.c.l.bf16 %v378_v45  ;;  %v382_v51 = vunpack.c.h.bf16 %v378_v45 }
  0x31   : > { %1212 = vmatpush3.bf16.msk.msra.mxu1 %vm1548_vm4, %v1453_v22  ;;  %1213 = vmatprep.mubr.msk.bf16.mxu1 %vm185_vm1, %v183_v55  ;;  %v805_v42 = vsub.f32 %v795_v21, %v801_v34  ;;  %v806_v43 = vsub.f32 %v796_v23, %v802_v35  ;;  %v807_v52 = vsub.f32 %v797_v36, %v803_v48 }
  0x32   : > { %1217 = vmatprep.subr.msk.bf16.mxu1 %vm1608_vm11, %v1453_v22  ;;  %v377_v26 = vpack.c.bf16 %v374_v20, %v373_v19  ;;  %v808_v53 = vsub.f32 %v798_v37, %v804_v49  ;;  %v385_v54 = vsub.f32 %v375_v38, %v381_v50  ;;  %v386_v55 = vsub.f32 %v376_v39, %v382_v51 }
  0x33   : > { %v809_v47 = vpack.c.bf16 %v806_v43, %v805_v42 }
  0x34   : > { %v379_v32 = vunpack.c.l.bf16 %v377_v26  ;;  %v380_v33 = vunpack.c.h.bf16 %v377_v26  ;;  %v810_v56 = vpack.c.bf16 %v808_v53, %v807_v52  ;;  %v388_v57 = vpack.c.bf16 %v386_v55, %v385_v54 }
  0x36   : > { %v383_v40 = vsub.f32 %v373_v19, %v379_v32  ;;  %v384_v41 = vsub.f32 %v374_v20, %v380_v33 }
  0x37   : > { %1250 = vmatmul.mubr.msk.bf16.vlgmr.msra.gmra.mrb[0].mxu0 %vm185_vm1, %v599_v5 }
  0x38   : > { %1254 = vmatpush3.bf16.msk.msra.mxu0 %vm1617_vm12, %v1453_v22  ;;  %1255 = vmatprep.mubr.msk.bf16.mxu0 %vm185_vm1, %v789_v10  ;;  %v387_v46 = vpack.c.bf16 %v384_v41, %v383_v40 }
  0x39   : > { %1259 = vmatprep.subr.msk.bf16.mxu0 %vm1617_vm12, %v1453_v22 }
  0x3c   : > { %1214 = vmatmul.mubr.msk.bf16.vlgmr.msra.gmra.mrb[0].mxu1 %vm185_vm1, %v184_v8 }
  0x3d   : > { %1218 = vmatpush3.bf16.msk.msra.mxu1 %vm1608_vm11, %v1453_v22  ;;  %1219 = vmatprep.mubr.msk.bf16.mxu1 %vm185_vm1, %v367_v9 }
  0x3e   : > { %1223 = vmatprep.subr.msk.bf16.mxu1 %vm1608_vm11, %v1453_v22 }
  0x43   : > { %1256 = vmatmul.mubr.msk.bf16.vlgmr.msra.gmra.mrb[0].mxu0 %vm185_vm1, %v790_v24 }
  0x44   : > { %1260 = vmatpush3.bf16.msk.msra.mxu0 %vm1617_vm12, %v1453_v22  ;;  %1261 = vmatprep.mubr.msk.bf16.mxu0 %vm185_vm1, %v799_v27 }
  0x45   : > { %1265 = vmatprep.subr.msk.bf16.mxu0 %vm1617_vm12, %v1453_v22 }
  0x48   : > { %1220 = vmatmul.mubr.msk.bf16.vlgmr.msra.gmra.mrb[0].mxu1 %vm185_vm1, %v368_v25 }
  0x49   : > { %1224 = vmatpush3.bf16.msk.msra.mxu1 %vm1608_vm11, %v1453_v22  ;;  %1225 = vmatprep.mubr.msk.bf16.mxu1 %vm185_vm1, %v377_v26 }
  0x4a   : > { %1229 = vmatprep.subr.msk.bf16.mxu1 %vm1608_vm11, %v1453_v22 }
  0x4f   : > { %1262 = vmatmul.mubr.msk.bf16.vlgmr.msra.gmra.mrb[0].mxu0 %vm185_vm1, %v800_v44 }
  0x50   : > { %1266 = vmatpush3.bf16.msk.msra.mxu0 %vm1617_vm12, %v1453_v22  ;;  %1267 = vmatprep.mubr.msk.bf16.mxu0 %vm185_vm1, %v809_v47 }
  0x54   : > { %1226 = vmatmul.mubr.msk.bf16.vlgmr.msra.gmra.mrb[0].mxu1 %vm185_vm1, %v378_v45 }
  0x55   : > { %1230 = vmatpush3.bf16.msk.msra.mxu1 %vm1608_vm11, %v1453_v22  ;;  %1231 = vmatprep.mubr.msk.bf16.mxu1 %vm185_vm1, %v387_v46 }
  0x5b   : > { %1268 = vmatmul.mubr.msk.bf16.vlgmr.msra.gmra.mrb[0].mxu0 %vm185_vm1, %v810_v56 }
  0x60   : > { %1232 = vmatmul.mubr.msk.bf16.vlgmr.msra.gmra.mrb[0].mxu1 %vm185_vm1, %v388_v57 }
 0x12e   : > { %v1269_v58 = vpop.f32.mrb[0].mxu0 }
 0x12f   : > { %v969_v22 = vpop.f32.mrb[1].mxu0 }
 0x130   : > { %v1270_v62 = vpop.f32.mrb[2].mxu0 }
 0x131   : > { %v972_v1 = vpop.f32.mrb[3].mxu0 }
 0x133   : > { %v1233_v59 = vpop.f32.mrb[0].mxu1 }
 0x134   : > { %v1271_v60 = vadd.f32 %v1269_v58, %v1233_v59  ;;  %v547_v61 = vpop.f32.mrb[1].mxu1 }
 0x135   : > { %v1272_v63 = vadd.f32 %v969_v22, %v547_v61  ;;  %v1234_v0 = vpop.f32.mrb[2].mxu1 }
 0x136   : > { %991 = vst.msk [vmem:[%s134_s27 + $0x10] sm:$0xff] %vm988_vm13, %v1271_v60  ;;  %v1273_v2 = vadd.f32 %v1270_v62, %v1234_v0  ;;  %v550_v3 = vpop.f32.mrb[3].mxu1 }
 0x137   : > { %989 = vst.msk [vmem:[%s134_s27] sm:$0xff] %vm988_vm13, %v1272_v63  ;;  %v1274_v4 = vadd.f32 %v972_v1, %v550_v3 }
 0x138   : > { %992 = vst.msk [vmem:[%s134_s27 + $0x18] sm:$0xff] %vm988_vm13, %v1273_v2 }
 0x139   : > { %990 = vst.msk [vmem:[%s134_s27 + $0x8] sm:$0xff] %vm988_vm13, %v1274_v4 }
 0x13a   : > { %1386 = shalt.err (!%p1383_p5)
}
 0x13b   : > { %s1387_s15 = scalar_lea.hbm %s1692_s3, 512  ;;  %s1391_s21 = scalar_lea.hbm %s1744_s1, 1024 }
 0x13c   : > { %p1388_p6 = scmp.ne.s32.totalorder %s1692_s3, %s1387_s15  ;;  %p1392_p10 = scmp.lt.u32.totalorder %s1692_s3, %s1744_s1 }
 0x13d   : > { %p1393_p11 = scmp.lt.u32.totalorder %s1391_s21, %s1387_s15  ;;  %p1395_p13 = scmp.lt.u32.totalorder %s1387_s15, %s1692_s3 }
 0x13e   : > { %p1389_p7 = pnand %p1388_p6, %p1507_p4 }
 0x13f   : > { %p1394_p12 = por %p1393_p11, %p1392_p10 }
 0x140   : > { %p1390_p9 = pneg %p1389_p7 }
 0x141   : > { %p1396_p0 = por %p1395_p13, %p1394_p12 }
 0x143   : > { %p1397_p1 = pnand %p1396_p0, %p1390_p9 }
 0x145   : > { %1400 = shalt.err (!%p1397_p1)
}
 0x146   : > { %s1455_s24 = smov 128   ;;  %s1456_s25 = smov 8  }
 0x147   : > { %1315 = dma.vmem_to_hbm [thread:$0]  (%p1507_p4), %s1687_s28, 512, %s1692_s3, %s1697_s4, %s1455_s24, %s1455_s24, %s1456_s25  }
 0x148 PF: > { %p1321_p2 = scmp.ge.s32.totalorder %s1451_s11, 2  ;;  %s1024_s26 = sand.u32 1, %s1431_s6  }
 0x149   : > { %s1025_s27 = scalar_lea.sflag [#allocation3], %s1024_s26 }
 0x14a   : > { %p1318_p3 = pnand %p1321_p2, %p1514_p8 }
 0x14c   : > { %1426 = dma.done.wait (!%p1318_p3), %s1025_s27, 512  }
 0x14d   : > { %1428 = vsyncadd (!%p1318_p3), %s1025_s27, 4294966784  ;;  %s14_s11 = sadd.s32 1, %s1451_s11   ;;  %s1755_s6 = smov %s1435_s7 }
 0x14e   : > { %p11_p5 = scmp.ge.s32.totalorder %s14_s11, 4   ;;  %s1756_s7 = smov %s1439_s8 }
 0x14f   : > { %s1757_s8 = smov %s1520_s19  ;;  %s1758_s9 = smov %s1447_s10 }
 0x150   : > { %s1759_s10 = smov %s1761_s14  ;;  %13 = sbr.rel (!%p11_p5) target bundleno = 4 (0x4), region = 62 }
 0x157   :  { %1030 = vsyncpa [#allocation3], 1 }
 0x158   :  { %1032 = vsyncpa [#allocation3 + $0x1], 1 }

</bundles_post_ra>
